<compile_context>
chip_gen: v7x
topology: tpu7x:2x2x1
jax: 0.10.0
libtpu: 0.0.40
codegen_flags: <defaults>
</compile_context>

<pallas_src>
import functools

import jax
import jax.numpy as jnp
from jax.experimental import pallas as pl
from jax.experimental.pallas import tpu as pltpu

LANE = 128
SUBLANE = 8


def _round_up(n, m):
    return ((n + m - 1) // m) * m


def gate_assort_kernel(x_ref, w1_ref, b1_ref, w2_ref, b2_ref, o_ref, *, matmul_dtype):
    x = x_ref[...]                                                     # (TB, Pp) f32
    xm = x.astype(matmul_dtype)
    # Layer 1: Linear + ReLU (MXU matmul, f32 accumulate; bias/ReLU on VPU)
    h = jnp.dot(xm, w1_ref[...], preferred_element_type=jnp.float32)   # (TB, Wp)
    h = jnp.maximum(h + b1_ref[...], 0.0)
    # Layer 2: Linear
    y = jnp.dot(h.astype(matmul_dtype), w2_ref[...],
                preferred_element_type=jnp.float32)                    # (TB, Pp)
    y = y + b2_ref[...]
    # Gate by the assortment row and replace exact zeros with -1e20
    score = y * x
    o_ref[...] = jnp.where(score == 0.0, jnp.float32(-1e20), score)


@functools.partial(jax.jit, static_argnames=("block_b", "matmul_dtype"))
def gate_assort_net(x, w1, b1, w2, b2, *, block_b=512, matmul_dtype=jnp.float32):
    """Forward pass of Gate_Assort_Net.

    x: (B, P) assortment rows; w1: (P, W); b1: (W,); w2: (W, P); b2: (P,)
    (weights pre-transposed relative to nn.Linear so the kernel runs plain
    row-major matmuls).  Returns (B, P) f32 scores.
    """
    B, P = x.shape
    Wd = w1.shape[1]

    # Pad lane dims to 128 and the batch to a multiple of the batch tile.
    Pp = _round_up(P, LANE)
    Wp = _round_up(Wd, LANE)
    TB = min(block_b, _round_up(B, SUBLANE))
    Bp = _round_up(B, TB)

    xp = jnp.pad(x.astype(jnp.float32), ((0, Bp - B), (0, Pp - P)))
    w1p = jnp.pad(w1.astype(matmul_dtype), ((0, Pp - P), (0, Wp - Wd)))
    b1p = jnp.pad(b1.astype(jnp.float32), (0, Wp - Wd)).reshape(1, Wp)
    w2p = jnp.pad(w2.astype(matmul_dtype), ((0, Wp - Wd), (0, Pp - P)))
    b2p = jnp.pad(b2.astype(jnp.float32), (0, Pp - P)).reshape(1, Pp)

    flops = 2 * Bp * Pp * Wp * 2                      # two matmuls
    bytes_accessed = 4 * (2 * Bp * Pp + 2 * Pp * Wp + Wp + Pp)

    out = pl.pallas_call(
        functools.partial(gate_assort_kernel, matmul_dtype=matmul_dtype),
        out_shape=jax.ShapeDtypeStruct((Bp, Pp), jnp.float32),
        grid_spec=pl.GridSpec(
            grid=(Bp // TB,),
            in_specs=[
                pl.BlockSpec((TB, Pp), lambda i: (i, 0)),   # x tile streams over batch
                pl.BlockSpec((Pp, Wp), lambda i: (0, 0)),   # W1 resident in VMEM
                pl.BlockSpec((1, Wp), lambda i: (0, 0)),    # b1 resident
                pl.BlockSpec((Wp, Pp), lambda i: (0, 0)),   # W2 resident
                pl.BlockSpec((1, Pp), lambda i: (0, 0)),    # b2 resident
            ],
            out_specs=pl.BlockSpec((TB, Pp), lambda i: (i, 0)),
        ),
        compiler_params=pltpu.CompilerParams(
            dimension_semantics=("parallel",),              # batch axis -> both TCs on v7x
        ),
        cost_estimate=pl.CostEstimate(
            flops=flops, transcendentals=0, bytes_accessed=bytes_accessed),
    )(xp, w1p, b1p, w2p, b2p)

    # Slice away batch/lane padding (padded columns hold -1e20 by design).
    return out[:B, :P]


def reference(x, w1, b1, w2, b2):
    h = jnp.maximum(x @ w1 + b1, 0.0)
    y = h @ w2 + b2
    score = y * x
    return jnp.where(score == 0.0, -1e20, score)


if __name__ == "__main__":
    # Small shapes consistent with Gate_Assort_Net(products, width):
    #   input_dim = len(products) = 16, width = 32, batch = 8
    P, WIDTH, B = 16, 32, 8

    key = jax.random.PRNGKey(0)
    k1, k2, k3, k4, kx, kx2 = jax.random.split(key, 6)

    # Deterministic parameter init (uniform +-1/sqrt(fan_in), like nn.Linear)
    bound1 = 1.0 / jnp.sqrt(jnp.float32(P))
    bound2 = 1.0 / jnp.sqrt(jnp.float32(WIDTH))
    w1 = jax.random.uniform(k1, (P, WIDTH), jnp.float32, -bound1, bound1)
    b1 = jax.random.uniform(k2, (WIDTH,), jnp.float32, -bound1, bound1)
    w2 = jax.random.uniform(k3, (WIDTH, P), jnp.float32, -bound2, bound2)
    b2 = jax.random.uniform(k4, (P,), jnp.float32, -bound2, bound2)

    # Assortment-style binary input (zeros exercise the -1e20 masking path)
    x = (jax.random.uniform(kx, (B, P)) > 0.5).astype(jnp.float32)
    x = x.at[:, 0].set(1.0)  # product 0 always offered (like probability_of)

    out = jax.block_until_ready(gate_assort_net(x, w1, b1, w2, b2))
    ref = reference(x, w1, b1, w2, b2)
    assert out.shape == (B, P)
    assert jnp.allclose(out, ref, rtol=1e-5, atol=1e-5), "mismatch vs reference"

    # Also exercise a multi-step grid (batch tiling + batch padding path).
    B2 = 24
    x2 = (jax.random.uniform(kx2, (B2, P)) > 0.5).astype(jnp.float32)
    x2 = x2.at[:, 0].set(1.0)
    out2 = jax.block_until_ready(gate_assort_net(x2, w1, b1, w2, b2, block_b=8))
    ref2 = reference(x2, w1, b1, w2, b2)
    assert out2.shape == (B2, P)
    assert jnp.allclose(out2, ref2, rtol=1e-5, atol=1e-5), "mismatch vs reference (tiled)"

    print("KERNEL_OK")
</pallas_src>

<mosaic_0001>
module attributes {stable_mosaic.version = 11 : i64} {
  func.func @gate_assort_kernel(%arg0: i32, %arg1: memref<8x128xf32, #tpu.memory_space<vmem>>, %arg2: memref<128x128xf32, #tpu.memory_space<vmem>>, %arg3: memref<1x128xf32, #tpu.memory_space<vmem>>, %arg4: memref<128x128xf32, #tpu.memory_space<vmem>>, %arg5: memref<1x128xf32, #tpu.memory_space<vmem>>, %arg6: memref<8x128xf32, #tpu.memory_space<vmem>>) attributes {dimension_semantics = [#tpu.dimension_semantics<parallel>], iteration_bounds = array<i64: 1>, scalar_prefetch = 0 : i64, scratch_operands = 0 : i64, tpu.core_type = #tpu.core_type<tc>, window_params = [{transform_indices = @transform_0, window_bounds = array<i64: 8, 128>}, {pipeline_mode = #tpu.pipeline_mode<synchronous>, transform_indices = @transform_1, window_bounds = array<i64: 128, 128>}, {pipeline_mode = #tpu.pipeline_mode<synchronous>, transform_indices = @transform_2, window_bounds = array<i64: 1, 128>}, {pipeline_mode = #tpu.pipeline_mode<synchronous>, transform_indices = @transform_3, window_bounds = array<i64: 128, 128>}, {pipeline_mode = #tpu.pipeline_mode<synchronous>, transform_indices = @transform_4, window_bounds = array<i64: 1, 128>}, {transform_indices = @transform_5, window_bounds = array<i64: 8, 128>}]} {
    %c0 = arith.constant 0 : index
    %c0_0 = arith.constant 0 : index
    %0 = vector.load %arg1[%c0, %c0_0] : memref<8x128xf32, #tpu.memory_space<vmem>>, vector<8x128xf32>
    %c0_1 = arith.constant 0 : index
    %c0_2 = arith.constant 0 : index
    %1 = vector.load %arg2[%c0_1, %c0_2] : memref<128x128xf32, #tpu.memory_space<vmem>>, vector<128x128xf32>
    %cst = arith.constant dense<0.000000e+00> : vector<8x128xf32>
    %2 = tpu.matmul %0, %1, %cst {dimension_numbers = #tpu.dot_dimension_numbers<[1], [0], [0], [1], [0, 0, 1, 1], [], []>} : vector<8x128xf32>, vector<128x128xf32>, vector<8x128xf32> -> vector<8x128xf32>
    %c0_3 = arith.constant 0 : index
    %c0_4 = arith.constant 0 : index
    %3 = vector.load %arg3[%c0_3, %c0_4] : memref<1x128xf32, #tpu.memory_space<vmem>>, vector<1x128xf32>
    %4 = vector.broadcast %3 : vector<1x128xf32> to vector<8x128xf32>
    %5 = arith.addf %2, %4 : vector<8x128xf32>
    %cst_5 = arith.constant 0.000000e+00 : f32
    %6 = vector.broadcast %cst_5 : f32 to vector<8x128xf32>
    %7 = arith.maximumf %5, %6 : vector<8x128xf32>
    %c0_6 = arith.constant 0 : index
    %c0_7 = arith.constant 0 : index
    %8 = vector.load %arg4[%c0_6, %c0_7] : memref<128x128xf32, #tpu.memory_space<vmem>>, vector<128x128xf32>
    %cst_8 = arith.constant dense<0.000000e+00> : vector<8x128xf32>
    %9 = tpu.matmul %7, %8, %cst_8 {dimension_numbers = #tpu.dot_dimension_numbers<[1], [0], [0], [1], [0, 0, 1, 1], [], []>} : vector<8x128xf32>, vector<128x128xf32>, vector<8x128xf32> -> vector<8x128xf32>
    %c0_9 = arith.constant 0 : index
    %c0_10 = arith.constant 0 : index
    %10 = vector.load %arg5[%c0_9, %c0_10] : memref<1x128xf32, #tpu.memory_space<vmem>>, vector<1x128xf32>
    %11 = vector.broadcast %10 : vector<1x128xf32> to vector<8x128xf32>
    %12 = arith.addf %9, %11 : vector<8x128xf32>
    %13 = arith.mulf %12, %0 : vector<8x128xf32>
    %cst_11 = arith.constant 0.000000e+00 : f32
    %14 = vector.broadcast %cst_11 : f32 to vector<8x128xf32>
    %15 = arith.cmpf oeq, %13, %14 : vector<8x128xf32>
    %cst_12 = arith.constant -1.000000e+20 : f32
    %16 = vector.broadcast %cst_12 : f32 to vector<8x128xf32>
    %17 = arith.select %15, %16, %13 : vector<8x128xi1>, vector<8x128xf32>
    %c0_13 = arith.constant 0 : index
    %c0_14 = arith.constant 0 : index
    %18 = vector.load %arg6[%c0_13, %c0_14] : memref<8x128xf32, #tpu.memory_space<vmem>>, vector<8x128xf32>
    tpu.vector_store %arg6[%c0_13, %c0_14], %17 {strides = array<i32>} : memref<8x128xf32, #tpu.memory_space<vmem>>, vector<8x128xf32>,
    return
  }
  func.func @transform_0(%arg0: i32) -> (i32, i32) {
    %c0_i32 = arith.constant 0 : i32
    %c0_i32_0 = arith.constant 0 : i32
    return %arg0, %c0_i32 : i32, i32
  }
  func.func @transform_1(%arg0: i32) -> (i32, i32) {
    %c0_i32 = arith.constant 0 : i32
    %c0_i32_0 = arith.constant 0 : i32
    %c0_i32_1 = arith.constant 0 : i32
    return %c0_i32, %c0_i32_0 : i32, i32
  }
  func.func @transform_2(%arg0: i32) -> (i32, i32) {
    %c0_i32 = arith.constant 0 : i32
    %c0_i32_0 = arith.constant 0 : i32
    %c0_i32_1 = arith.constant 0 : i32
    return %c0_i32, %c0_i32_0 : i32, i32
  }
  func.func @transform_3(%arg0: i32) -> (i32, i32) {
    %c0_i32 = arith.constant 0 : i32
    %c0_i32_0 = arith.constant 0 : i32
    %c0_i32_1 = arith.constant 0 : i32
    return %c0_i32, %c0_i32_0 : i32, i32
  }
  func.func @transform_4(%arg0: i32) -> (i32, i32) {
    %c0_i32 = arith.constant 0 : i32
    %c0_i32_0 = arith.constant 0 : i32
    %c0_i32_1 = arith.constant 0 : i32
    return %c0_i32, %c0_i32_0 : i32, i32
  }
  func.func @transform_5(%arg0: i32) -> (i32, i32) {
    %c0_i32 = arith.constant 0 : i32
    %c0_i32_0 = arith.constant 0 : i32
    return %arg0, %c0_i32 : i32, i32
  }
}

</mosaic_0001>

<bundles_post_ra>
// kernel: gate_assort_net.1
= control target key start
LH: loop header
LB: loop body
LE: loop exit
PB: predicated region body
PF: predicated region fallthrough
CT: control target
= control target key end

     0   :  { %v409_v3 = vmov 0.0|0.0   ;;  %vm410_vm0 = vmmov 0   ;;  %v411_v6 = vmov 0.0   ;;  %s576_s0 = inlined_call_operand.vmem [shape: f32[8,128], index: 0, kind: input, shape index: {}]   ;;  %s577_s1 = inlined_call_operand.vmem [shape: f32[128,128], index: 1, kind: input, shape index: {}]   ;;  %s578_s2 = inlined_call_operand.vmem [shape: f32[1,128], index: 2, kind: input, shape index: {}]   ;;  %s579_s3 = inlined_call_operand.vmem [shape: f32[128,128], index: 3, kind: input, shape index: {}]   ;;  %s580_s4 = inlined_call_operand.vmem [shape: f32[1,128], index: 4, kind: input, shape index: {}]   ;;  %s581_s5 = inlined_call_operand.hbm [shape: f32[8,128], index: 5, kind: output, shape index: {}]  }
   0x1   :  { %v22_v0 = vld [vmem:[%s577_s1] sm:$0xff]  ;;  %v23_v1 = vld [vmem:[%s577_s1 + $0x8] sm:$0xff]  ;;  %v24_v2 = vld [vmem:[%s577_s1 + $0x10] sm:$0xff]  ;;  %333 = vmatprep.subr.bf16.mxu0 %v409_v3  ;;  %295 = vmatprep.mubr.msk.f32.mxu0 %vm410_vm0, %v411_v6 }
   0x2   :  { %v334_v4 = vpack.c.bf16 %v23_v1, %v22_v0  ;;  %v25_v5 = vld [vmem:[%s577_s1 + $0x18] sm:$0xff]  ;;  %357 = vmatprep.subr.bf16.mxu1 %v409_v3  ;;  %330 = vmatprep.mubr.msk.f32.mxu1 %vm410_vm0, %v411_v6  ;;  %v26_v8 = vld [vmem:[%s577_s1 + $0x20] sm:$0xff]  ;;  %v27_v9 = vld [vmem:[%s577_s1 + $0x28] sm:$0xff] }
   0x3   :  { %v337_v7 = vpack.c.bf16 %v25_v5, %v24_v2  ;;  %v116_v10 = vld [vmem:[%s579_s3] sm:$0xff]  ;;  %v117_v11 = vld [vmem:[%s579_s3 + $0x8] sm:$0xff]  ;;  %v118_v12 = vld [vmem:[%s579_s3 + $0x10] sm:$0xff]  ;;  %v340_v14 = vpack.c.bf16 %v27_v9, %v26_v8 }
   0x4   :  { %335 = vmatpush3.bf16.msra.mxu0 %v334_v4  ;;  %v119_v13 = vld [vmem:[%s579_s3 + $0x18] sm:$0xff]  ;;  %v358_v15 = vpack.c.bf16 %v117_v11, %v116_v10  ;;  %v28_v16 = vld [vmem:[%s577_s1 + $0x30] sm:$0xff]  ;;  %v120_v19 = vld [vmem:[%s579_s3 + $0x20] sm:$0xff] }
   0x5   :  { %336 = vmatprep.subr.bf16.mxu0 %v409_v3  ;;  %v29_v17 = vld [vmem:[%s577_s1 + $0x38] sm:$0xff]  ;;  %v361_v18 = vpack.c.bf16 %v119_v13, %v118_v12  ;;  %v121_v20 = vld [vmem:[%s579_s3 + $0x28] sm:$0xff] }
   0x6   :  { %359 = vmatpush3.bf16.msra.mxu1 %v358_v15 }
   0x7   :  { %360 = vmatprep.subr.bf16.mxu1 %v409_v3 }
   0x8   :  { %338 = vmatpush3.bf16.msra.mxu0 %v337_v7 }
   0x9   :  { %339 = vmatprep.subr.bf16.mxu0 %v409_v3 }
   0xa   :  { %10 = vsyncpa [#allocation3], 0  ;;  %v343_v21 = vpack.c.bf16 %v29_v17, %v28_v16  ;;  %v30_v22 = vld [vmem:[%s577_s1 + $0x40] sm:$0xff]  ;;  %v31_v23 = vld [vmem:[%s577_s1 + $0x48] sm:$0xff]  ;;  %362 = vmatpush3.bf16.msra.mxu1 %v361_v18  ;;  %v364_v24 = vpack.c.bf16 %v121_v20, %v120_v19  ;;  %s412_s11 = smov [#allocation2]  }
   0xb   :  { %363 = vmatprep.subr.bf16.mxu1 %v409_v3  ;;  %v122_v25 = vld [vmem:[%s579_s3 + $0x30] sm:$0xff]  ;;  %v123_v26 = vld [vmem:[%s579_s3 + $0x38] sm:$0xff]  ;;  %v346_v27 = vpack.c.bf16 %v31_v23, %v30_v22  ;;  %v124_v31 = vld [vmem:[%s579_s3 + $0x40] sm:$0xff] }
   0xc   :  { %341 = vmatpush3.bf16.msra.mxu0 %v340_v14  ;;  %v32_v28 = vld [vmem:[%s577_s1 + $0x50] sm:$0xff]  ;;  %v33_v29 = vld [vmem:[%s577_s1 + $0x58] sm:$0xff]  ;;  %v367_v30 = vpack.c.bf16 %v123_v26, %v122_v25  ;;  %v125_v32 = vld [vmem:[%s579_s3 + $0x48] sm:$0xff] }
   0xd   :  { %342 = vmatprep.subr.bf16.mxu0 %v409_v3  ;;  %v349_v33 = vpack.c.bf16 %v33_v29, %v32_v28  ;;  %v34_v34 = vld [vmem:[%s577_s1 + $0x60] sm:$0xff]  ;;  %v35_v35 = vld [vmem:[%s577_s1 + $0x68] sm:$0xff]  ;;  %v370_v36 = vpack.c.bf16 %v125_v32, %v124_v31  ;;  %v126_v37 = vld [vmem:[%s579_s3 + $0x50] sm:$0xff] }
   0xe   :  { %365 = vmatpush3.bf16.msra.mxu1 %v364_v24  ;;  %v127_v38 = vld [vmem:[%s579_s3 + $0x58] sm:$0xff]  ;;  %v352_v39 = vpack.c.bf16 %v35_v35, %v34_v34  ;;  %v36_v40 = vld [vmem:[%s577_s1 + $0x70] sm:$0xff]  ;;  %v128_v43 = vld [vmem:[%s579_s3 + $0x60] sm:$0xff] }
   0xf   :  { %366 = vmatprep.subr.bf16.mxu1 %v409_v3  ;;  %v37_v41 = vld [vmem:[%s577_s1 + $0x78] sm:$0xff]  ;;  %v373_v42 = vpack.c.bf16 %v127_v38, %v126_v37  ;;  %v129_v44 = vld [vmem:[%s579_s3 + $0x68] sm:$0xff]  ;;  %v21_v47 = vld [vmem:[%s576_s0] sm:$0xff] }
  0x10   :  { %344 = vmatpush3.bf16.msra.mxu0 %v343_v21  ;;  %v355_v45 = vpack.c.bf16 %v37_v41, %v36_v40  ;;  %v376_v46 = vpack.c.bf16 %v129_v44, %v128_v43  ;;  %v130_v48 = vld [vmem:[%s579_s3 + $0x70] sm:$0xff]  ;;  %v131_v49 = vld [vmem:[%s579_s3 + $0x78] sm:$0xff]  ;;  %v227_v51 = vld [vmem:[%s578_s2] ss:$0 sm:$0xff]  ;;  %s219_s3 = sshll.u32 %s412_s11, 4  ;;  %s220_s3 = int_to_ptr.vmem [resolvable:$true] %s219_s3 }
  0x11   :  { %345 = vmatprep.subr.bf16.mxu0 %v409_v3  ;;  %v379_v50 = vpack.c.bf16 %v131_v49, %v130_v48  ;;  %v228_v56 = vld [vmem:[%s580_s4] ss:$0 sm:$0xff]  ;;  %s385_s2 = scalar_lea.vmem %s220_s3, 128  ;;  %p390_p1 = scmp.lt.s32.totalorder %s220_s3, %s220_s3 }
  0x12   :  { %368 = vmatpush3.bf16.msra.mxu1 %v367_v30  ;;  %p386_p0 = scmp.ne.s32.totalorder %s220_s3, %s385_s2  ;;  %p391_p2 = scmp.lt.s32.totalorder %s385_s2, %s385_s2 }
  0x13   :  { %369 = vmatprep.subr.bf16.mxu1 %v409_v3 }
  0x14   :  { %347 = vmatpush3.bf16.msra.mxu0 %v346_v27  ;;  %p392_p3 = por %p391_p2, %p390_p1 }
  0x15   :  { %348 = vmatprep.subr.bf16.mxu0 %v409_v3 }
  0x16   :  { %371 = vmatpush3.bf16.msra.mxu1 %v370_v36  ;;  %p393_p4 = pnand %p392_p3, %p386_p0 }
  0x17   :  { %372 = vmatprep.subr.bf16.mxu1 %v409_v3 }
  0x18   :  { %350 = vmatpush3.bf16.msra.mxu0 %v349_v33 }
  0x19   :  { %351 = vmatprep.subr.bf16.mxu0 %v409_v3 }
  0x1a   :  { %374 = vmatpush3.bf16.msra.mxu1 %v373_v42 }
  0x1b   :  { %375 = vmatprep.subr.bf16.mxu1 %v409_v3 }
  0x1c   :  { %353 = vmatpush3.bf16.msra.mxu0 %v352_v39 }
  0x1d   :  { %354 = vmatprep.subr.bf16.mxu0 %v409_v3 }
  0x1e   :  { %377 = vmatpush3.bf16.msra.mxu1 %v376_v46 }
  0x1f   :  { %378 = vmatprep.subr.bf16.mxu1 %v409_v3 }
  0x20   :  { %356 = vmatpush3.bf16.msra.mxu0 %v355_v45 }
  0x22   :  { %380 = vmatpush3.bf16.msra.mxu1 %v379_v50 }
  0x23   :  { %296 = vmatmul.mubr.f32.vlgmr.msra.gmra.mrb[0].mxu0 %v21_v47 }
  0xf6   :  { %v111_v52 = vpop.f32.mrb[0].mxu0 }
  0xf7   :  { %v112_v53 = vadd.f32 %v227_v51, %v111_v52  ;;  %v297_v54 = vpop.f32.mrb[1].mxu0 }
  0xf9   :  { %v115_v55 = vmax.f32 %v112_v53, 0.0 }
  0xfb   :  { %331 = vmatmul.mubr.f32.vlgmr.msra.gmra.mrb[0].mxu1 %v115_v55 }
 0x1ce   :  { %v205_v57 = vpop.f32.mrb[0].mxu1 }
 0x1cf   :  { %v206_v58 = vadd.f32 %v228_v56, %v205_v57  ;;  %v332_v59 = vpop.f32.mrb[1].mxu1 }
 0x1d1   :  { %v209_v60 = vmul.f32 %v206_v58, %v21_v47 }
 0x1d3   :  { %vm210_vm1 = vcmp.eq.f32.partialorder %v209_v60, 0.0 }
 0x1d4   :  { %v211_v61 = vsel %vm210_vm1, -1e+20, %v209_v60 }
 0x1d5   :  { %212 = vst [vmem:[#allocation2] sm:$0xff] %v211_v61 }
 0x1d6   :  { %396 = shalt.err (!%p393_p4)
}
 0x1d7   :  { %s397_s4 = scalar_lea.hbm %s581_s5, 128 }
 0x1d8   :  { %p398_p5 = scmp.ne.s32.totalorder %s581_s5, %s397_s4  ;;  %p401_p6 = scmp.lt.u32.totalorder %s397_s4, %s581_s5 }
 0x1da   :  { %p403_p7 = pnand %p401_p6, %p398_p5 }
 0x1dc   :  { %406 = shalt.err (!%p403_p7)
}
 0x1dd   :  { %222 = dma.vmem_to_hbm [thread:$0]  %s220_s3, 128, %s581_s5, [#allocation3]  }
 0x1de   :  { %407 = dma.done.wait [#allocation3], 128  }
 0x1df   :  { %408 = vsyncadd [#allocation3], 4294967168 }
 0x1e0   :  { %226 = vsyncpa [#allocation3], 1 }

</bundles_post_ra>
